<compile_context>
chip_gen: v7x
topology: tpu7x:2x2x1
jax: 0.10.0
libtpu: 0.0.40
codegen_flags: <defaults>
</compile_context>

<pallas_src>
import functools

import jax
import jax.numpy as jnp
from jax.experimental import pallas as pl
from jax.experimental.pallas import tpu as pltpu


def _round_up(n, m):
    return pl.cdiv(n, m) * m


def mlp_kernel(x_ref, w1_ref, b1_ref, w2_ref, b2_ref, w3_ref, b3_ref, o_ref,
               *, out_size, chunk_rows):
    """One batch tile: fc1 -> ReLU -> fc2 -> ReLU -> fc3 -> softmax(dim=1)."""
    w1 = w1_ref[...]
    w2 = w2_ref[...]
    w3 = w3_ref[...]
    b1 = b1_ref[...]
    b2 = b2_ref[...]
    b3 = b3_ref[...]

    tb = x_ref.shape[0]
    out_p = w3.shape[1]
    # Padded logit columns (>= out_size) are masked out of the softmax.
    valid = jax.lax.broadcasted_iota(jnp.int32, (1, out_p), 1) < out_size

    # Static unroll over sub-chunks: independent chunks let the scheduler
    # overlap the next chunk's MXU work with this chunk's VPU/EUP epilogue.
    for start in range(0, tb, chunk_rows):
        rows = slice(start, min(start + chunk_rows, tb))
        xc = x_ref[rows, :].astype(jnp.bfloat16)    # bf16 cast in-kernel
        # fc1 + ReLU (bf16 operands, f32 accumulation); fused epilogue keeps
        # only one f32 (chunk, hid) intermediate live at a time.
        h1 = jnp.maximum(
            jnp.dot(xc, w1, preferred_element_type=jnp.float32) + b1, 0.0
        ).astype(jnp.bfloat16)
        # fc2 + ReLU
        h2 = jnp.maximum(
            jnp.dot(h1, w2, preferred_element_type=jnp.float32) + b2, 0.0
        ).astype(jnp.bfloat16)
        # fc3
        logits = jnp.dot(h2, w3, preferred_element_type=jnp.float32) + b3
        logits = jnp.where(valid, logits, jnp.float32(-1e30))
        # softmax over dim=1, exact normalization
        m = jnp.max(logits, axis=1, keepdims=True)
        e = jnp.exp(logits - m)
        probs = e / jnp.sum(e, axis=1, keepdims=True)
        # Store only the native-width columns (no padded writeback).
        o_ref[rows, :] = probs[:, :out_size].astype(o_ref.dtype)


def prepare_params(params):
    """One-time pad-to-128-lanes + bf16 cast of the matmul operands."""
    w1, b1 = params["w1"], params["b1"]
    w2, b2 = params["w2"], params["b2"]
    w3, b3 = params["w3"], params["b3"]
    in_size, hid = w1.shape
    out_size = w3.shape[1]
    hid_p = _round_up(hid, 128)
    out_p = _round_up(out_size, 128)

    def pad2(a, rows, cols, dtype):
        a = a.astype(dtype)
        return jnp.pad(a, ((0, rows - a.shape[0]), (0, cols - a.shape[1])))

    prepared = {
        # w1 keeps its native input width so x needs no lane padding.
        "w1": pad2(w1, in_size, hid_p, jnp.bfloat16),
        "b1": pad2(b1, 1, hid_p, jnp.float32),
        "w2": pad2(w2, hid_p, hid_p, jnp.bfloat16),
        "b2": pad2(b2, 1, hid_p, jnp.float32),
        "w3": pad2(w3, hid_p, out_p, jnp.bfloat16),
        "b3": pad2(b3, 1, out_p, jnp.float32),
    }
    dims = (in_size, hid, out_size)   # native (unpadded) sizes, Python ints
    return prepared, dims


def _choose_batch_tile(B, max_tile=1024):
    # Target 512-1024 row tiles, 16-row aligned (bf16 sublane packing), with
    # bounded padding waste; force >=2 grid steps once B >= 32 so v7x megacore
    # can split the batch across its two TensorCores.
    n_tiles = pl.cdiv(B, max_tile)
    if n_tiles == 1 and B >= 32:
        n_tiles = 2
    tb = _round_up(pl.cdiv(B, n_tiles), 16)
    b_p = _round_up(B, tb)
    return tb, b_p


def mlp_forward(x, prepared, dims):
    """x: (B, input_size) f32.  prepared/dims: output of prepare_params()."""
    in_size, hid, out_size = dims
    w1, b1 = prepared["w1"], prepared["b1"]
    w2, b2 = prepared["w2"], prepared["b2"]
    w3, b3 = prepared["w3"], prepared["b3"]
    hid_p = w1.shape[1]
    out_p = w3.shape[1]

    B = x.shape[0]
    assert x.shape[1] == in_size
    tb, b_p = _choose_batch_tile(B)
    grid = (b_p // tb,)
    chunk_rows = min(128, tb)

    # Only the batch dim ever needs padding (features stay at native width).
    if b_p != B:
        x = jnp.pad(x, ((0, b_p - B), (0, 0)))

    resident = lambda shape: pl.BlockSpec(shape, lambda i: (0, 0))
    in_specs = [
        pl.BlockSpec((tb, in_size), lambda i: (i, 0)),  # x: tiled over batch
        resident((in_size, hid_p)),                     # w1 (VMEM-resident)
        resident((1, hid_p)),                           # b1
        resident((hid_p, hid_p)),                       # w2
        resident((1, hid_p)),                           # b2
        resident((hid_p, out_p)),                       # w3
        resident((1, out_p)),                           # b3
    ]
    out_specs = pl.BlockSpec((tb, out_size), lambda i: (i, 0))

    # Explicit VMEM budget: double-buffered x/out tiles + (double-buffered)
    # resident weights + a few f32 (chunk, hid) intermediates, 2x headroom.
    resident_bytes = ((w1.size + w2.size + w3.size) * 2
                      + (b1.size + b2.size + b3.size) * 4) * 2
    act_bytes = 2 * tb * in_size * 4 + 2 * tb * out_size * 4
    scratch_bytes = 6 * chunk_rows * hid_p * 4
    vmem_limit = int(min(max(2 * (resident_bytes + act_bytes + scratch_bytes),
                             16 << 20), 48 << 20))

    flops = 2 * b_p * (in_size * hid_p + hid_p * hid_p + hid_p * out_p)
    bytes_accessed = (x.size * 4
                      + (w1.size + w2.size + w3.size) * 2
                      + (b1.size + b2.size + b3.size) * 4
                      + b_p * out_size * 4)
    cost = pl.CostEstimate(flops=flops, transcendentals=b_p * out_p,
                           bytes_accessed=bytes_accessed)

    out = pl.pallas_call(
        functools.partial(mlp_kernel, out_size=out_size, chunk_rows=chunk_rows),
        out_shape=jax.ShapeDtypeStruct((b_p, out_size), jnp.float32),
        grid=grid,
        in_specs=in_specs,
        out_specs=out_specs,
        compiler_params=pltpu.CompilerParams(
            dimension_semantics=("parallel",),
            vmem_limit_bytes=vmem_limit),
        cost_estimate=cost,
    )(x, w1, b1, w2, b2, w3, b3)

    return out[:B] if b_p != B else out


def init_params(key, input_size, hidden_size, output_size):
    """Deterministic init matching nn.Linear shapes (weights stored (in, out))."""
    ks = jax.random.split(key, 6)

    def linear(kw, kb, fan_in, fan_out):
        bound = 1.0 / jnp.sqrt(fan_in)
        w = jax.random.uniform(kw, (fan_in, fan_out), jnp.float32, -bound, bound)
        b = jax.random.uniform(kb, (1, fan_out), jnp.float32, -bound, bound)
        return w, b

    w1, b1 = linear(ks[0], ks[1], input_size, hidden_size)
    w2, b2 = linear(ks[2], ks[3], hidden_size, hidden_size)
    w3, b3 = linear(ks[4], ks[5], hidden_size, output_size)
    return {"w1": w1, "b1": b1, "w2": w2, "b2": b2, "w3": w3, "b3": b3}


def mlp_reference_f32(x, p):
    """Pure-f32 reference equivalent to the PyTorch module."""
    h1 = jnp.maximum(x @ p["w1"] + p["b1"], 0.0)
    h2 = jnp.maximum(h1 @ p["w2"] + p["b2"], 0.0)
    return jax.nn.softmax(h2 @ p["w3"] + p["b3"], axis=1)


def mlp_reference_bf16(x, p):
    """Mirrors the kernel's numerics (bf16 matmul operands, f32 accumulation)."""
    def bdot(a, w):
        return jnp.dot(a.astype(jnp.bfloat16), w.astype(jnp.bfloat16),
                       preferred_element_type=jnp.float32)
    h1 = jnp.maximum(bdot(x, p["w1"]) + p["b1"], 0.0)
    h2 = jnp.maximum(bdot(h1, p["w2"]) + p["b2"], 0.0)
    return jax.nn.softmax(bdot(h2, p["w3"]) + p["b3"], axis=1)


if __name__ == "__main__":
    key = jax.random.PRNGKey(0)
    k_x, k_p = jax.random.split(key)

    batch, input_size, hidden_size, output_size = 8, 16, 32, 8
    x = jax.random.normal(k_x, (batch, input_size), dtype=jnp.float32)
    params = init_params(k_p, input_size, hidden_size, output_size)

    prepared, dims = prepare_params(params)   # one-time pad + bf16 cast
    fwd = jax.jit(lambda xx: mlp_forward(xx, prepared, dims))

    out = fwd(x)
    jax.block_until_ready(out)
    assert out.shape == (batch, output_size)

    # Numerics match a bf16-matmul / f32-accumulate reference tightly ...
    ref_bf16 = mlp_reference_bf16(x, params)
    assert jnp.allclose(out, ref_bf16, atol=2e-3, rtol=2e-3)
    # ... and the pure-f32 (PyTorch-equivalent) reference within bf16 tolerance.
    # TODO(synk): run the dots in f32 if exact f32 parity with nn.Linear is required.
    ref_f32 = mlp_reference_f32(x, params)
    assert jnp.allclose(out, ref_f32, atol=2e-2, rtol=2e-2)
    # Softmax rows sum to 1 (exact normalization in the kernel).
    assert jnp.allclose(jnp.sum(out, axis=1), jnp.ones((batch,)), atol=1e-5)

    print("KERNEL_OK")
</pallas_src>

<mosaic_0001>
module attributes {stable_mosaic.version = 11 : i64} {
  func.func @mlp_kernel(%arg0: i32, %arg1: memref<16x16xf32, #tpu.memory_space<vmem>>, %arg2: memref<16x128xbf16, #tpu.memory_space<vmem>>, %arg3: memref<1x128xf32, #tpu.memory_space<vmem>>, %arg4: memref<128x128xbf16, #tpu.memory_space<vmem>>, %arg5: memref<1x128xf32, #tpu.memory_space<vmem>>, %arg6: memref<128x128xbf16, #tpu.memory_space<vmem>>, %arg7: memref<1x128xf32, #tpu.memory_space<vmem>>, %arg8: memref<16x8xf32, #tpu.memory_space<vmem>>) attributes {dimension_semantics = [#tpu.dimension_semantics<parallel>], iteration_bounds = array<i64: 1>, scalar_prefetch = 0 : i64, scratch_operands = 0 : i64, tpu.core_type = #tpu.core_type<tc>, window_params = [{transform_indices = @transform_0, window_bounds = array<i64: 16, 16>}, {pipeline_mode = #tpu.pipeline_mode<synchronous>, transform_indices = @transform_1, window_bounds = array<i64: 16, 128>}, {pipeline_mode = #tpu.pipeline_mode<synchronous>, transform_indices = @transform_2, window_bounds = array<i64: 1, 128>}, {pipeline_mode = #tpu.pipeline_mode<synchronous>, transform_indices = @transform_3, window_bounds = array<i64: 128, 128>}, {pipeline_mode = #tpu.pipeline_mode<synchronous>, transform_indices = @transform_4, window_bounds = array<i64: 1, 128>}, {pipeline_mode = #tpu.pipeline_mode<synchronous>, transform_indices = @transform_5, window_bounds = array<i64: 128, 128>}, {pipeline_mode = #tpu.pipeline_mode<synchronous>, transform_indices = @transform_6, window_bounds = array<i64: 1, 128>}, {transform_indices = @transform_7, window_bounds = array<i64: 16, 8>}]} {
    %c0 = arith.constant 0 : index
    %c0_0 = arith.constant 0 : index
    %0 = vector.load %arg2[%c0, %c0_0] : memref<16x128xbf16, #tpu.memory_space<vmem>>, vector<16x128xbf16>
    %c0_1 = arith.constant 0 : index
    %c0_2 = arith.constant 0 : index
    %1 = vector.load %arg4[%c0_1, %c0_2] : memref<128x128xbf16, #tpu.memory_space<vmem>>, vector<128x128xbf16>
    %c0_3 = arith.constant 0 : index
    %c0_4 = arith.constant 0 : index
    %2 = vector.load %arg6[%c0_3, %c0_4] : memref<128x128xbf16, #tpu.memory_space<vmem>>, vector<128x128xbf16>
    %c0_5 = arith.constant 0 : index
    %c0_6 = arith.constant 0 : index
    %3 = vector.load %arg3[%c0_5, %c0_6] : memref<1x128xf32, #tpu.memory_space<vmem>>, vector<1x128xf32>
    %c0_7 = arith.constant 0 : index
    %c0_8 = arith.constant 0 : index
    %4 = vector.load %arg5[%c0_7, %c0_8] : memref<1x128xf32, #tpu.memory_space<vmem>>, vector<1x128xf32>
    %c0_9 = arith.constant 0 : index
    %c0_10 = arith.constant 0 : index
    %5 = vector.load %arg7[%c0_9, %c0_10] : memref<1x128xf32, #tpu.memory_space<vmem>>, vector<1x128xf32>
    %6 = tpu.iota {dimensions = array<i32: 1>} : vector<1x128xi32>
    %c8_i32 = arith.constant 8 : i32
    %7 = vector.broadcast %c8_i32 : i32 to vector<1x128xi32>
    %8 = arith.cmpi slt, %6, %7 : vector<1x128xi32>
    %c0_11 = arith.constant 0 : index
    %c0_12 = arith.constant 0 : index
    %9 = vector.load %arg1[%c0_11, %c0_12] : memref<16x16xf32, #tpu.memory_space<vmem>>, vector<16x16xf32>
    %10 = arith.truncf %9 : vector<16x16xf32> to vector<16x16xbf16>
    %cst = arith.constant dense<0.000000e+00> : vector<16x128xf32>
    %11 = tpu.matmul %10, %0, %cst {dimension_numbers = #tpu.dot_dimension_numbers<[1], [0], [0], [1], [0, 0, 1, 1], [], []>} : vector<16x16xbf16>, vector<16x128xbf16>, vector<16x128xf32> -> vector<16x128xf32>
    %12 = vector.broadcast %3 : vector<1x128xf32> to vector<16x128xf32>
    %13 = arith.addf %11, %12 : vector<16x128xf32>
    %cst_13 = arith.constant 0.000000e+00 : f32
    %14 = vector.broadcast %cst_13 : f32 to vector<16x128xf32>
    %15 = arith.maximumf %13, %14 : vector<16x128xf32>
    %16 = arith.truncf %15 : vector<16x128xf32> to vector<16x128xbf16>
    %cst_14 = arith.constant dense<0.000000e+00> : vector<16x128xf32>
    %17 = tpu.matmul %16, %1, %cst_14 {dimension_numbers = #tpu.dot_dimension_numbers<[1], [0], [0], [1], [0, 0, 1, 1], [], []>} : vector<16x128xbf16>, vector<128x128xbf16>, vector<16x128xf32> -> vector<16x128xf32>
    %18 = vector.broadcast %4 : vector<1x128xf32> to vector<16x128xf32>
    %19 = arith.addf %17, %18 : vector<16x128xf32>
    %cst_15 = arith.constant 0.000000e+00 : f32
    %20 = vector.broadcast %cst_15 : f32 to vector<16x128xf32>
    %21 = arith.maximumf %19, %20 : vector<16x128xf32>
    %22 = arith.truncf %21 : vector<16x128xf32> to vector<16x128xbf16>
    %cst_16 = arith.constant dense<0.000000e+00> : vector<16x128xf32>
    %23 = tpu.matmul %22, %2, %cst_16 {dimension_numbers = #tpu.dot_dimension_numbers<[1], [0], [0], [1], [0, 0, 1, 1], [], []>} : vector<16x128xbf16>, vector<128x128xbf16>, vector<16x128xf32> -> vector<16x128xf32>
    %24 = vector.broadcast %5 : vector<1x128xf32> to vector<16x128xf32>
    %25 = arith.addf %23, %24 : vector<16x128xf32>
    %cst_17 = arith.constant -1.000000e+30 : f32
    %26 = vector.shape_cast %8 : vector<1x128xi1> to vector<1x128xi1>
    %27 = vector.broadcast %26 : vector<1x128xi1> to vector<16x128xi1>
    %28 = vector.broadcast %cst_17 : f32 to vector<16x128xf32>
    %29 = arith.select %27, %25, %28 : vector<16x128xi1>, vector<16x128xf32>
    %cst_18 = arith.constant dense<0xFF800000> : vector<16xf32>
    %30 = vector.multi_reduction <maximumf>, %29, %cst_18 [1] : vector<16x128xf32> to vector<16xf32>
    %31 = vector.shape_cast %30 : vector<16xf32> to vector<16x1xf32>
    %32 = vector.broadcast %31 : vector<16x1xf32> to vector<16x128xf32>
    %33 = arith.subf %29, %32 : vector<16x128xf32>
    %34 = math.exp %33 : vector<16x128xf32>
    %cst_19 = arith.constant dense<0.000000e+00> : vector<16xf32>
    %35 = vector.multi_reduction <add>, %34, %cst_19 [1] : vector<16x128xf32> to vector<16xf32>
    %36 = vector.shape_cast %35 : vector<16xf32> to vector<16x1xf32>
    %37 = vector.broadcast %36 : vector<16x1xf32> to vector<16x128xf32>
    %38 = arith.divf %34, %37 : vector<16x128xf32>
    %39 = vector.extract_strided_slice %38 {offsets = [0, 0], sizes = [16, 8], strides = [1, 1]} : vector<16x128xf32> to vector<16x8xf32>
    %c0_20 = arith.constant 0 : index
    %c0_21 = arith.constant 0 : index
    %40 = vector.load %arg8[%c0_20, %c0_21] : memref<16x8xf32, #tpu.memory_space<vmem>>, vector<16x8xf32>
    tpu.vector_store %arg8[%c0_20, %c0_21], %39 {strides = array<i32>} : memref<16x8xf32, #tpu.memory_space<vmem>>, vector<16x8xf32>,
    return
  }
  func.func @transform_0(%arg0: i32) -> (i32, i32) {
    %c0_i32 = arith.constant 0 : i32
    %c0_i32_0 = arith.constant 0 : i32
    return %arg0, %c0_i32 : i32, i32
  }
  func.func @transform_1(%arg0: i32) -> (i32, i32) {
    %c0_i32 = arith.constant 0 : i32
    %c0_i32_0 = arith.constant 0 : i32
    %c0_i32_1 = arith.constant 0 : i32
    return %c0_i32, %c0_i32_0 : i32, i32
  }
  func.func @transform_2(%arg0: i32) -> (i32, i32) {
    %c0_i32 = arith.constant 0 : i32
    %c0_i32_0 = arith.constant 0 : i32
    %c0_i32_1 = arith.constant 0 : i32
    return %c0_i32, %c0_i32_0 : i32, i32
  }
  func.func @transform_3(%arg0: i32) -> (i32, i32) {
    %c0_i32 = arith.constant 0 : i32
    %c0_i32_0 = arith.constant 0 : i32
    %c0_i32_1 = arith.constant 0 : i32
    return %c0_i32, %c0_i32_0 : i32, i32
  }
  func.func @transform_4(%arg0: i32) -> (i32, i32) {
    %c0_i32 = arith.constant 0 : i32
    %c0_i32_0 = arith.constant 0 : i32
    %c0_i32_1 = arith.constant 0 : i32
    return %c0_i32, %c0_i32_0 : i32, i32
  }
  func.func @transform_5(%arg0: i32) -> (i32, i32) {
    %c0_i32 = arith.constant 0 : i32
    %c0_i32_0 = arith.constant 0 : i32
    %c0_i32_1 = arith.constant 0 : i32
    return %c0_i32, %c0_i32_0 : i32, i32
  }
  func.func @transform_6(%arg0: i32) -> (i32, i32) {
    %c0_i32 = arith.constant 0 : i32
    %c0_i32_0 = arith.constant 0 : i32
    %c0_i32_1 = arith.constant 0 : i32
    return %c0_i32, %c0_i32_0 : i32, i32
  }
  func.func @transform_7(%arg0: i32) -> (i32, i32) {
    %c0_i32 = arith.constant 0 : i32
    %c0_i32_0 = arith.constant 0 : i32
    return %arg0, %c0_i32 : i32, i32
  }
}

</mosaic_0001>

<bundles_post_ra>
// kernel: _lambda_.1
= control target key start
LH: loop header
LB: loop body
LE: loop exit
PB: predicated region body
PF: predicated region fallthrough
CT: control target
= control target key end

     0   :  { %12 = vsyncpa [#allocation3], 0  ;;  %s665_s0 = inlined_call_operand.vmem [shape: f32[16,16], index: 0, kind: input, shape index: {}]   ;;  %s666_s1 = inlined_call_operand.vmem [shape: bf16[16,128], index: 1, kind: input, shape index: {}]   ;;  %s667_s2 = inlined_call_operand.vmem [shape: f32[1,128], index: 2, kind: input, shape index: {}]   ;;  %s668_s3 = inlined_call_operand.hbm [shape: bf16[128,128], index: 3, kind: input, shape index: {}]   ;;  %s669_s4 = inlined_call_operand.vmem [shape: f32[1,128], index: 4, kind: input, shape index: {}]   ;;  %s670_s5 = inlined_call_operand.hbm [shape: bf16[128,128], index: 5, kind: input, shape index: {}]   ;;  %s671_s6 = inlined_call_operand.vmem [shape: f32[1,128], index: 6, kind: input, shape index: {}]   ;;  %s672_s7 = inlined_call_operand.vmem [shape: f32[16,8], index: 7, kind: output, shape index: {}]  }
   0x1   :  { %13 = vsyncpa [#allocation5], 0  ;;  %s548_s24 = smov [#allocation2]   ;;  %s500_s28 = scalar_lea.hbm %s668_s3, 1024 }
   0x2   :  { %s25_s25 = sshll.u32 %s548_s24, 4  ;;  %p501_p0 = scmp.ne.s32.totalorder %s668_s3, %s500_s28  ;;  %s26_s25 = int_to_ptr.vmem [resolvable:$true] %s25_s25 }
   0x3   :  { %p504_p1 = scmp.lt.u32.totalorder %s500_s28, %s668_s3 }
   0x5   :  { %p506_p2 = pnand %p504_p1, %p501_p0 }
   0x7   :  { %509 = shalt.err (!%p506_p2)
}
   0x8   :  { %s510_s10 = scalar_lea.vmem %s26_s25, 1024  ;;  %p515_p4 = scmp.lt.s32.totalorder %s26_s25, %s26_s25 }
   0x9   :  { %p511_p3 = scmp.ne.s32.totalorder %s26_s25, %s510_s10  ;;  %p516_p5 = scmp.lt.s32.totalorder %s510_s10, %s510_s10 }
   0xb   :  { %p517_p6 = por %p516_p5, %p515_p4 }
   0xd   :  { %p518_p7 = pnand %p517_p6, %p511_p3 }
   0xf   :  { %521 = shalt.err (!%p518_p7)
}
  0x10   :  { %s549_s11 = smov 64   ;;  %s550_s12 = smov 4  }
  0x11   :  { %31 = dma.hbm_to_vmem [thread:$0]  %s668_s3, 1024, %s26_s25, [#allocation3], %s549_s11, %s549_s11, %s550_s12  }
  0x12   :  { %s551_s15 = smov [#allocation4]   ;;  %s522_s19 = scalar_lea.hbm %s670_s5, 1024 }
  0x13   :  { %s39_s16 = sshll.u32 %s551_s15, 4  ;;  %p523_p8 = scmp.ne.s32.totalorder %s670_s5, %s522_s19  ;;  %s40_s16 = int_to_ptr.vmem [resolvable:$true] %s39_s16 }
  0x14   :  { %p526_p9 = scmp.lt.u32.totalorder %s522_s19, %s670_s5 }
  0x16   :  { %p528_p10 = pnand %p526_p9, %p523_p8 }
  0x18   :  { %531 = shalt.err (!%p528_p10)
}
  0x19   :  { %s532_s24 = scalar_lea.vmem %s40_s16, 1024  ;;  %p537_p12 = scmp.lt.s32.totalorder %s40_s16, %s40_s16 }
  0x1a   :  { %p533_p11 = scmp.ne.s32.totalorder %s40_s16, %s532_s24  ;;  %p538_p13 = scmp.lt.s32.totalorder %s532_s24, %s532_s24 }
  0x1c   :  { %p539_p0 = por %p538_p13, %p537_p12 }
  0x1e   :  { %p540_p1 = pnand %p539_p0, %p533_p11 }
  0x20   :  { %543 = shalt.err (!%p540_p1)
}
  0x21   :  { %45 = dma.hbm_to_vmem [thread:$0]  %s670_s5, 1024, %s40_s16, [#allocation5], %s549_s11, %s549_s11, %s550_s12  }
  0x22   :  { %544 = dma.done.wait [#allocation3], 1024  }
  0x23   :  { %545 = vsyncadd [#allocation3], 4294966272 }
  0x24   :  { %546 = dma.done.wait [#allocation5], 1024  }
  0x25   :  { %547 = vsyncadd [#allocation5], 4294966272  ;;  %v552_v0 = vmov 0.0   ;;  %vm553_vm0 = vmmov 0   ;;  %v475_v1 = vld [vmem:[%s666_s1] sm:$0xff]   ;;  %v96_v3 = vld [vmem:[%s665_s0 + $0x8] sm:$0xff]  ;;  %v92_v41 = vlaneseq }
  0x26   :  { %423 = vmatprep.subr.bf16.mxu0 %v552_v0  ;;  %425 = vmatprep.mubr.msk.bf16.mxu0 %vm553_vm0, %v552_v0  ;;  %v95_v2 = vld [vmem:[%s665_s0] sm:$0xff]  ;;  %vm110_vm1 = vcmask 130048   ;;  %v477_v6 = vld [vmem:[#allocation2 + $0x8] sm:$0xff]   ;;  %v478_v7 = vld [vmem:[#allocation2 + $0x10] sm:$0xff]   ;;  %vm373_vm3 = vcmask 64512  }
  0x27   :  { %429 = vmatprep.subr.bf16.mxu1 %v552_v0  ;;  %445 = vmatprep.mubr.msk.bf16.mxu1 %vm553_vm0, %v552_v0  ;;  %v97_v4 = vpack.c.bf16 %v96_v3, %v95_v2  ;;  %v476_v5 = vld [vmem:[#allocation2] sm:$0xff]   ;;  %v479_v8 = vld [vmem:[#allocation2 + $0x18] sm:$0xff]   ;;  %v481_v10 = vld [vmem:[#allocation2 + $0x28] sm:$0xff]   ;;  %v93_v42 = vand.u32 127, %v92_v41 }
  0x28   :  { %424 = vmatpush3.bf16.msra.mxu0 %v475_v1  ;;  %430 = vmatpush3.bf16.msra.mxu1 %v476_v5  ;;  %v480_v9 = vld [vmem:[#allocation2 + $0x20] sm:$0xff]   ;;  %v482_v11 = vld [vmem:[#allocation2 + $0x30] sm:$0xff]   ;;  %v483_v12 = vld [vmem:[#allocation2 + $0x38] sm:$0xff]  }
  0x29   :  { %449 = vmatprep.subr.bf16.mxu0 %v552_v0  ;;  %431 = vmatprep.subr.bf16.mxu1 %v552_v0  ;;  %v484_v13 = vld [vmem:[#allocation4] sm:$0xff]   ;;  %v485_v14 = vld [vmem:[#allocation4 + $0x8] sm:$0xff]   ;;  %v486_v15 = vld [vmem:[#allocation4 + $0x10] sm:$0xff]   ;;  %vm94_vm2 = vcmp.lt.s32.totalorder %v93_v42, 8 }
  0x2a   :  { %v487_v16 = vld [vmem:[#allocation4 + $0x18] sm:$0xff]   ;;  %v488_v17 = vld [vmem:[#allocation4 + $0x20] sm:$0xff]   ;;  %v489_v18 = vld [vmem:[#allocation4 + $0x28] sm:$0xff]  }
  0x2b   :  { %426 = vmatmul.mubr.msk.bf16.vlgmr.msra.gmra.mrb[0].mxu0 %vm110_vm1, %v97_v4  ;;  %v382_v19 = vld [vmem:[%s667_s2] ss:$0 sm:$0xff]  ;;  %v490_v29 = vld [vmem:[#allocation4 + $0x30] sm:$0xff]   ;;  %v491_v30 = vld [vmem:[#allocation4 + $0x38] sm:$0xff]  }
  0x2c   :  { %465 = vmatprep.mubr.msk.bf16.mxu0 %vm553_vm0, %v552_v0  ;;  %432 = vmatpush3.bf16.msra.mxu1 %v477_v6  ;;  %v385_v31 = vld [vmem:[%s669_s4] ss:$0 sm:$0xff] }
  0x2d   :  { %433 = vmatprep.subr.bf16.mxu1 %v552_v0  ;;  %450 = vmatpush3.bf16.msra.mxu0 %v484_v13  ;;  %v394_v43 = vld [vmem:[%s671_s6] ss:$0 sm:$0xff] }
  0x2e   :  { %451 = vmatprep.subr.bf16.mxu0 %v552_v0 }
  0x30   :  { %434 = vmatpush3.bf16.msra.mxu1 %v478_v7 }
  0x31   :  { %435 = vmatprep.subr.bf16.mxu1 %v552_v0  ;;  %452 = vmatpush3.bf16.msra.mxu0 %v485_v14 }
  0x32   :  { %453 = vmatprep.subr.bf16.mxu0 %v552_v0 }
  0x34   :  { %436 = vmatpush3.bf16.msra.mxu1 %v479_v8 }
  0x35   :  { %437 = vmatprep.subr.bf16.mxu1 %v552_v0  ;;  %454 = vmatpush3.bf16.msra.mxu0 %v486_v15 }
  0x36   :  { %455 = vmatprep.subr.bf16.mxu0 %v552_v0 }
  0x38   :  { %438 = vmatpush3.bf16.msra.mxu1 %v480_v9 }
  0x39   :  { %439 = vmatprep.subr.bf16.mxu1 %v552_v0  ;;  %456 = vmatpush3.bf16.msra.mxu0 %v487_v16 }
  0x3a   :  { %457 = vmatprep.subr.bf16.mxu0 %v552_v0 }
  0x3c   :  { %440 = vmatpush3.bf16.msra.mxu1 %v481_v10 }
  0x3d   :  { %441 = vmatprep.subr.bf16.mxu1 %v552_v0  ;;  %458 = vmatpush3.bf16.msra.mxu0 %v488_v17 }
  0x3e   :  { %459 = vmatprep.subr.bf16.mxu0 %v552_v0 }
  0x40   :  { %442 = vmatpush3.bf16.msra.mxu1 %v482_v11 }
  0x41   :  { %443 = vmatprep.subr.bf16.mxu1 %v552_v0  ;;  %460 = vmatpush3.bf16.msra.mxu0 %v489_v18 }
  0x42   :  { %461 = vmatprep.subr.bf16.mxu0 %v552_v0 }
  0x44   :  { %444 = vmatpush3.bf16.msra.mxu1 %v483_v12 }
  0x45   :  { %462 = vmatpush3.bf16.msra.mxu0 %v490_v29 }
  0x46   :  { %463 = vmatprep.subr.bf16.mxu0 %v552_v0 }
  0x49   :  { %464 = vmatpush3.bf16.msra.mxu0 %v491_v30 }
  0xfe   :  { %v148_v20 = vpop.f32.mrb[0].mxu0 }
  0xff   :  { %v149_v21 = vadd.f32 %v382_v19, %v148_v20  ;;  %v427_v22 = vpop.f32.mrb[1].mxu0 }
 0x100   :  { %v151_v23 = vpop.f32.mrb[2].mxu0 }
 0x101   :  { %v152_v24 = vadd.f32 %v382_v19, %v151_v23  ;;  %v428_v25 = vpop.f32.mrb[3].mxu0  ;;  %v155_v26 = vmax.f32 %v149_v21, 0.0 }
 0x103   :  { %v156_v27 = vmax.f32 %v152_v24, 0.0 }
 0x105   :  { %v157_v28 = vpack.c.bf16 %v156_v27, %v155_v26 }
 0x107   :  { %446 = vmatmul.mubr.bf16.vlgmr.msra.gmra.mrb[0].mxu1 %v157_v28 }
 0x1da   :  { %v246_v32 = vpop.f32.mrb[0].mxu1 }
 0x1db   :  { %v247_v33 = vadd.f32 %v385_v31, %v246_v32  ;;  %v447_v34 = vpop.f32.mrb[1].mxu1 }
 0x1dc   :  { %v249_v35 = vpop.f32.mrb[2].mxu1 }
 0x1dd   :  { %v250_v36 = vadd.f32 %v385_v31, %v249_v35  ;;  %v448_v37 = vpop.f32.mrb[3].mxu1  ;;  %v253_v38 = vmax.f32 %v247_v33, 0.0 }
 0x1df   :  { %v254_v39 = vmax.f32 %v250_v36, 0.0 }
 0x1e1   :  { %v255_v40 = vpack.c.bf16 %v254_v39, %v253_v38 }
 0x1e3   :  { %466 = vmatmul.mubr.bf16.vlgmr.msra.gmra.mrb[4].mxu0 %v255_v40 }
 0x2b6   :  { %v344_v44 = vpop.f32.mrb[4].mxu0 }
 0x2b7   :  { %v345_v45 = vadd.f32 %v394_v43, %v344_v44  ;;  %v467_v46 = vpop.f32.mrb[5].mxu0 }
 0x2b8   :  { %v347_v47 = vpop.f32.mrb[6].mxu0 }
 0x2b9   :  { %v348_v48 = vadd.f32 %v394_v43, %v347_v47  ;;  %v468_v49 = vpop.f32.mrb[7].mxu0  ;;  %v353_v50 = vsel %vm94_vm2, %v345_v45, -1e+30 }
 0x2ba   :  { %355 = vmax.xlane.f32.xlu0 %v353_v50 }
 0x2bb   :  { %v354_v51 = vsel %vm94_vm2, %v348_v48, -1e+30 }
 0x2be   :  { %357 = vmax.xlane.f32.xlu0 %v354_v51 }
 0x347   :  { %v356_v52 = vpop.xlane.xlu0 %355 }
 0x348   :  { %v359_v53 = vsub.f32 %v353_v50, %v356_v52 }
 0x34a   :  { %v361_v54 = vmul.f32 1.442695, %v359_v53 }
 0x34b   :  { %v358_v55 = vpop.xlane.xlu0 %357 }
 0x34c   :  { %492 = vpow2.f32 %v361_v54  ;;  %v360_v56 = vsub.f32 %v354_v51, %v358_v55 }
 0x34e   :  { %v363_v57 = vmul.f32 1.442695, %v360_v56 }
 0x350   :  { %494 = vpow2.f32 %v363_v57 }
 0x356   :  { %v493_v58 = vpop.eup %492 }
 0x357   :  { %365 = vadd.xlane.f32.xlu1 %v493_v58 }
 0x35a   :  { %v495_v59 = vpop.eup %494 }
 0x35b   :  { %367 = vadd.xlane.f32.xlu1 %v495_v59 }
 0x3e4   :  { %v366_v60 = vpop.xlane.xlu1 %365 }
 0x3e5   :  { %496 = vrcp.f32 %v366_v60 }
 0x3e8   :  { %v368_v61 = vpop.xlane.xlu1 %367 }
 0x3e9   :  { %498 = vrcp.f32 %v368_v61 }
 0x3ef   :  { %v497_v62 = vpop.eup %496 }
 0x3f0   :  { %v370_v63 = vmul.f32 %v497_v62, %v493_v58 }
 0x3f2   :  { %374 = vst.msk [vmem:[%s672_s7] sm:$0xff] %vm373_vm3, %v370_v63 }
 0x3f3   :  { %v499_v0 = vpop.eup %498 }
 0x3f4   :  { %v372_v1 = vmul.f32 %v499_v0, %v495_v59 }
 0x3f6   :  { %375 = vst.msk [vmem:[%s672_s7 + $0x8] sm:$0xff] %vm373_vm3, %v372_v1 }
 0x3f7   :  { %380 = vsyncpa [#allocation3], 1 }
 0x3f8   :  { %381 = vsyncpa [#allocation5], 1 }

</bundles_post_ra>
